<compile_context>
chip_gen: v7x
topology: tpu7x:2x2x1
jax: 0.10.0
libtpu: 0.0.40
codegen_flags: <defaults>
</compile_context>

<pallas_src>
import functools

import numpy as np
import jax
import jax.numpy as jnp
from jax import lax
from jax.experimental import pallas as pl
from jax.experimental.pallas import tpu as pltpu


# ----------------------------- parameter setup ------------------------------
def _hadamard(n):
    """Sylvester Hadamard matrix (n must be a power of 2)."""
    assert n > 0 and (n & (n - 1)) == 0, "bit width must be a power of 2"
    H = np.array([[1.0]], dtype=np.float64)
    while H.shape[0] < n:
        H = np.block([[H, H], [H, -H]])
    return H


def get_hash_targets(n_class, bit):
    H_K = _hadamard(bit)
    H_2K = np.concatenate((H_K, -H_K), 0)
    # Small synthetic setup: 2*bit >= n_class, so the reference's host-side
    # random re-sampling loop is never reached.
    # TODO(synk): the n_class > 2*bit random re-sampling loop (init-time, host
    # code in the reference) is not implemented.
    assert H_2K.shape[0] >= n_class
    return jnp.asarray(H_2K[:n_class], dtype=jnp.float32)


# ------------------------------ kernel helpers -------------------------------
def _sum11(x):
    """Full sum kept as a (1,1) array (no scalar extraction needed)."""
    return jnp.sum(jnp.sum(x, axis=1, keepdims=True), axis=0, keepdims=True)


def _row_softmax(x):
    m = jnp.max(x, axis=1, keepdims=True)
    e = jnp.exp(x - m)
    # Divide -> approximate EUP reciprocal (EUP slot is idle relative to MXU here).
    return e * pl.reciprocal(jnp.sum(e, axis=1, keepdims=True), approx=True)


def _pick_tile(batch, pref=256):
    """Query/key row tile for the blocked eigen loss.

    256 fills the v6e/v7x 256x256 MXU (128 is the floor on v5e); fall back to
    the largest power-of-two divisor, or the whole batch for tiny/ragged B.
    """
    if batch <= pref:
        return batch
    for t in (pref, 128, 64, 32, 16, 8):
        if batch % t == 0:
            return t
    # TODO(synk): ragged batch sizes fall back to a single monolithic row block.
    return batch


# --------------------------------- kernel ------------------------------------
def _dhmi_loss_kernel(y_ref, uL_ref, uS_ref, htL_ref, htS_ref, rcL_ref, rcS_ref,
                      out_ref, zL_ref, zS_ref, ab_ref, ba_ref, *,
                      init_bits, bits, lam, single_label, tq):
    f32, bf16 = jnp.float32, jnp.bfloat16
    dn_nt = (((1,), (1,)), ((), ()))          # contract feature dims -> A @ B.T

    qi, ki = pl.program_id(0), pl.program_id(1)
    nk = pl.num_programs(1)
    B = uL_ref.shape[0]
    row_q = pl.multiple_of(qi * tq, tq)
    row_k = pl.multiple_of(ki * tq, tq)

    # bf16 operands feed the MXU (f32 accumulation); elementwise math stays f32.
    uL_bf = uL_ref[...].astype(bf16)                      # (B, WL)
    uS_bf = uS_ref[...].astype(bf16)                      # (B, WS)
    uLq_bf = uL_ref[pl.ds(row_q, tq), :].astype(bf16)     # (TQ, WL)
    uSq_bf = uS_ref[pl.ds(row_q, tq), :].astype(bf16)
    uLk_bf = uL_ref[pl.ds(row_k, tq), :].astype(bf16)     # (TK, WL)
    uSk_bf = uS_ref[pl.ds(row_k, tq), :].astype(bf16)

    # ---- per-q-block init: full-row logsumexp stats + zero AB/BA accumulators --
    @pl.when(ki == 0)
    def _init():
        covLq = lax.dot_general(uLq_bf, uL_bf, dn_nt, preferred_element_type=f32)
        covSq = lax.dot_general(uSq_bf, uS_bf, dn_nt, preferred_element_type=f32)
        mL = jnp.max(covLq, axis=1, keepdims=True)
        mS = jnp.max(covSq, axis=1, keepdims=True)
        zL_ref[...] = mL + jnp.log(jnp.sum(jnp.exp(covLq - mL), axis=1, keepdims=True))
        zS_ref[...] = mS + jnp.log(jnp.sum(jnp.exp(covSq - mS), axis=1, keepdims=True))
        ab_ref[...] = jnp.zeros_like(ab_ref)
        ba_ref[...] = jnp.zeros_like(ba_ref)

    # ---- accumulate AB / BA row blocks over the key axis -----------------------
    # L_ij[q rows, k cols] reconstructed from the stored logsumexp (only sublane-
    # dim ref slices; no lane-dim dynamic slicing).
    covLqk = lax.dot_general(uLq_bf, uLk_bf, dn_nt, preferred_element_type=f32)  # (TQ, TK)
    covSqk = lax.dot_general(uSq_bf, uSk_bf, dn_nt, preferred_element_type=f32)
    L_qk = jnp.exp(covLqk - zL_ref[...])
    S_qk = jnp.exp(covSqk - zS_ref[...])

    # Full softmax rows of L_ij / S_ij for the key-block rows.
    covLk = lax.dot_general(uLk_bf, uL_bf, dn_nt, preferred_element_type=f32)    # (TK, B)
    covSk = lax.dot_general(uSk_bf, uS_bf, dn_nt, preferred_element_type=f32)
    L_k = _row_softmax(covLk)
    S_k = _row_softmax(covSk)

    ab_ref[...] += jnp.dot(L_qk.astype(bf16), S_k.astype(bf16),
                           preferred_element_type=f32)
    ba_ref[...] += jnp.dot(S_qk.astype(bf16), L_k.astype(bf16),
                           preferred_element_type=f32)

    # ---- finalize: center/quant terms for this row block + eigen partial -------
    @pl.when(ki == nk - 1)
    def _finalize():
        uLq = uL_ref[pl.ds(row_q, tq), :].astype(f32)
        uSq = uS_ref[pl.ds(row_q, tq), :].astype(f32)
        y_q = y_ref[pl.ds(row_q, tq), :].astype(f32)
        htL = htL_ref[...].astype(f32)
        htS = htS_ref[...].astype(f32)
        C = y_q.shape[1]

        if single_label:
            # hash_targets[argmax(y,1)] as a one-hot matmul (first-max tie-break,
            # identical to torch.argmax for one-hot labels).
            # TODO(synk): if integer class ids were available at the call site,
            # an SMEM label input + iota compare would skip this argmax emulation.
            col = lax.broadcasted_iota(jnp.int32, (tq, C), 1)
            row_max = jnp.max(y_q, axis=1, keepdims=True)
            first_idx = jnp.min(jnp.where(y_q == row_max, col, C),
                                axis=1, keepdims=True)
            onehot = (col == first_idx).astype(f32)
            hcL = jnp.dot(onehot, htL, preferred_element_type=f32)   # (TQ, WL) ±1
            hcS = jnp.dot(onehot, htS, preferred_element_type=f32)
        else:
            rcL = rcL_ref[...].astype(f32)
            rcS = rcS_ref[...].astype(f32)
            csL = jnp.dot(y_q, htL, preferred_element_type=f32)
            csS = jnp.dot(y_q, htS, preferred_element_type=f32)
            csL = jnp.where(csL == 0.0, jnp.broadcast_to(rcL, csL.shape), csL)
            csS = jnp.where(csS == 0.0, jnp.broadcast_to(rcS, csS.shape), csS)
            hcL = 2.0 * (csL > 0.0).astype(f32) - 1.0
            hcS = 2.0 * (csS > 0.0).astype(f32) - 1.0

        # One-log BCE: t = 0.5*(hc+1) in {0,1}, p = 0.5*(u+1)
        #   BCE(p, t) = -clamp(log(0.5*(1 + hc*u)), -100)
        cL = -jnp.maximum(jnp.log(0.5 * (1.0 + hcL * uLq)), -100.0)
        cS = -jnp.maximum(jnp.log(0.5 * (1.0 + hcS * uSq)), -100.0)
        # Reference divides by self.bits for BOTH branches.
        wL = cL * jnp.exp(-cL / bits)
        wS = cS * jnp.exp(-cS / bits)
        # Fused center + quantization reductions: one sum per branch.
        gL = 0.5 * wL + lam * (jnp.abs(uLq) - 1.0) ** 2
        gS = wS + lam * (jnp.abs(uSq) - 1.0) ** 2

        diff = ab_ref[...] - ba_ref[...]
        partial = (_sum11(gL) * (1.0 / (B * init_bits))
                   + _sum11(gS) * (1.0 / (B * bits))
                   + _sum11(diff * diff) * (1.0 / (B * B)))
        out_ref[0] = partial


# ------------------------------ fused forward ---------------------------------
@functools.partial(jax.jit,
                   static_argnames=("init_bits", "bits", "lam", "single_label"))
def _dhmi_forward(u_L, u_S, y, ht_L, ht_S, rc_L, rc_S, *,
                  init_bits, bits, lam, single_label):
    B, WL = u_L.shape
    WS = u_S.shape[1]
    C = y.shape[1]
    tq = _pick_tile(B)
    num_q = B // tq

    kernel = functools.partial(
        _dhmi_loss_kernel,
        init_bits=int(init_bits), bits=int(bits), lam=float(lam),
        single_label=bool(single_label), tq=int(tq))

    # Explicit scoped-VMEM budget sized from B: resident inputs (x2 buffers),
    # in-kernel bf16 copies, AB/BA accumulators, cov/softmax/product temporaries
    # (with margin).  Capped at 100 MiB for v5e/v6e (128 MiB physical); on v7x
    # (64 MiB physical) shrink `tq` rather than raising the cap.
    est = (2 * 4 * (B * (WL + WS + C) + C * (WL + WS) + (WL + WS))
           + 2 * B * (WL + WS)
           + 4 * (2 * tq * B + 2 * tq)
           + 4 * 16 * tq * max(B, 128)
           + (1 << 20))
    vmem_limit = int(min(max(est, 16 << 20), 100 << 20))

    def full(shape):
        return pl.BlockSpec(shape, lambda q, k: (0,) * len(shape))

    out = pl.pallas_call(
        kernel,
        out_shape=jax.ShapeDtypeStruct((num_q, 1, 1), jnp.float32),
        grid=(num_q, num_q),
        in_specs=[full(y.shape), full(u_L.shape), full(u_S.shape),
                  full(ht_L.shape), full(ht_S.shape),
                  full(rc_L.shape), full(rc_S.shape)],
        out_specs=pl.BlockSpec((1, 1, 1), lambda q, k: (q, 0, 0)),
        scratch_shapes=[pltpu.VMEM((tq, 1), jnp.float32),   # logsumexp L
                        pltpu.VMEM((tq, 1), jnp.float32),   # logsumexp S
                        pltpu.VMEM((tq, B), jnp.float32),   # AB row-block acc
                        pltpu.VMEM((tq, B), jnp.float32)],  # BA row-block acc
        compiler_params=pltpu.CompilerParams(
            dimension_semantics=("parallel", "arbitrary"),
            vmem_limit_bytes=vmem_limit),
    )(y, u_L, u_S, ht_L, ht_S, rc_L, rc_S)
    # Per-row-block partial losses -> scalar (tiny, fused into the same dispatch).
    return jnp.sum(out)


# --------------------------------- module -------------------------------------
class DHMILossPallas:
    def __init__(self, config, bits, init_bits, n_class):
        self.bits = int(bits)
        self.init_bits = int(init_bits)
        self.is_single_label = config['dataset'] not in {'nuswide_21', 'nuswide_21_m', 'coco'}

        # Deterministic synthetic parameter init (no checkpoint load).
        ht_L = get_hash_targets(n_class, self.init_bits)   # (n_class, init_bits), ±1
        ht_S = get_hash_targets(n_class, self.bits)        # (n_class, bits),      ±1
        k1, k2 = jax.random.split(jax.random.PRNGKey(42))
        rc_L = jax.random.randint(k1, (self.init_bits,), 0, 2).astype(jnp.float32)
        rc_S = jax.random.randint(k2, (self.bits,), 0, 2).astype(jnp.float32)
        self.hash_targets, self.hash_targets_S = ht_L, ht_S
        self.multi_label_random_center = rc_L
        self.multi_label_random_center_S = rc_S
        # 2-D row-vector views for the kernel (broadcast in-kernel in multi-label mode).
        self._rc_L = rc_L[None, :]
        self._rc_S = rc_S[None, :]

    def __call__(self, u, u_L, u_S, y, ind, config):
        # NOTE: `u` and `ind` are unused by the reference forward too.
        return _dhmi_forward(
            u_L, u_S, y, self.hash_targets, self.hash_targets_S,
            self._rc_L, self._rc_S,
            init_bits=self.init_bits, bits=self.bits,
            lam=float(config['lambda']), single_label=self.is_single_label)


# ---------------------------------- main ---------------------------------------
if __name__ == "__main__":
    B, n_class, bits, init_bits = 8, 10, 32, 64
    config = {'dataset': 'cifar10', 'n_class': n_class, 'lambda': 1e-4, 'device': None}

    loss_mod = DHMILossPallas(config, bits, init_bits, n_class)

    key = jax.random.PRNGKey(0)
    k1, k2, k3, k4 = jax.random.split(key, 4)
    u = jnp.tanh(jax.random.normal(k1, (B, bits), jnp.float32))          # unused (matches reference)
    u_L = jnp.tanh(jax.random.normal(k2, (B, init_bits), jnp.float32))   # long hash logits in (-1,1)
    u_S = jnp.tanh(jax.random.normal(k3, (B, bits), jnp.float32))        # short hash logits in (-1,1)
    labels = jax.random.randint(k4, (B,), 0, n_class)
    y = jax.nn.one_hot(labels, n_class, dtype=jnp.float32)
    ind = jnp.arange(B)

    loss = loss_mod(u, u_L, u_S, y, ind, config)
    jax.block_until_ready(loss)
    assert jnp.isfinite(loss)
    print("KERNEL_OK")
</pallas_src>

<mosaic_0001>
module attributes {stable_mosaic.version = 11 : i64} {
  func.func @_dhmi_loss_kernel(%arg0: i32, %arg1: i32, %arg2: memref<8x10xf32, #tpu.memory_space<vmem>>, %arg3: memref<8x64xf32, #tpu.memory_space<vmem>>, %arg4: memref<8x32xf32, #tpu.memory_space<vmem>>, %arg5: memref<10x64xf32, #tpu.memory_space<vmem>>, %arg6: memref<10x32xf32, #tpu.memory_space<vmem>>, %arg7: memref<1x64xf32, #tpu.memory_space<vmem>>, %arg8: memref<1x32xf32, #tpu.memory_space<vmem>>, %arg9: memref<1x1x1xf32, #tpu.memory_space<vmem>>, %arg10: memref<8x1xf32, #tpu.memory_space<vmem>>, %arg11: memref<8x1xf32, #tpu.memory_space<vmem>>, %arg12: memref<8x8xf32, #tpu.memory_space<vmem>>, %arg13: memref<8x8xf32, #tpu.memory_space<vmem>>) attributes {dimension_semantics = [#tpu.dimension_semantics<parallel>, #tpu.dimension_semantics<arbitrary>], iteration_bounds = array<i64: 1, 1>, scalar_prefetch = 0 : i64, scratch_operands = 4 : i64, tpu.core_type = #tpu.core_type<tc>, window_params = [{pipeline_mode = #tpu.pipeline_mode<synchronous>, transform_indices = @transform_0, window_bounds = array<i64: 8, 10>}, {pipeline_mode = #tpu.pipeline_mode<synchronous>, transform_indices = @transform_1, window_bounds = array<i64: 8, 64>}, {pipeline_mode = #tpu.pipeline_mode<synchronous>, transform_indices = @transform_2, window_bounds = array<i64: 8, 32>}, {pipeline_mode = #tpu.pipeline_mode<synchronous>, transform_indices = @transform_3, window_bounds = array<i64: 10, 64>}, {pipeline_mode = #tpu.pipeline_mode<synchronous>, transform_indices = @transform_4, window_bounds = array<i64: 10, 32>}, {pipeline_mode = #tpu.pipeline_mode<synchronous>, transform_indices = @transform_5, window_bounds = array<i64: 1, 64>}, {pipeline_mode = #tpu.pipeline_mode<synchronous>, transform_indices = @transform_6, window_bounds = array<i64: 1, 32>}, {transform_indices = @transform_7, window_bounds = array<i64: 1, 1, 1>}]} {
    %c8_i32 = arith.constant 8 : i32
    %0 = arith.muli %arg0, %c8_i32 : i32
    %1 = tpu.assume_multiple %0, 8 : i32
    %c8_i32_0 = arith.constant 8 : i32
    %2 = arith.muli %arg1, %c8_i32_0 : i32
    %3 = tpu.assume_multiple %2, 8 : i32
    %c0 = arith.constant 0 : index
    %c0_1 = arith.constant 0 : index
    %4 = vector.load %arg3[%c0, %c0_1] : memref<8x64xf32, #tpu.memory_space<vmem>>, vector<8x64xf32>
    %5 = arith.truncf %4 : vector<8x64xf32> to vector<8x64xbf16>
    %c0_2 = arith.constant 0 : index
    %c0_3 = arith.constant 0 : index
    %6 = vector.load %arg4[%c0_2, %c0_3] : memref<8x32xf32, #tpu.memory_space<vmem>>, vector<8x32xf32>
    %7 = arith.truncf %6 : vector<8x32xf32> to vector<8x32xbf16>
    %8 = arith.index_cast %1 : i32 to index
    %c0_4 = arith.constant 0 : index
    %9 = vector.load %arg3[%8, %c0_4] : memref<8x64xf32, #tpu.memory_space<vmem>>, vector<8x64xf32>
    %10 = arith.truncf %9 : vector<8x64xf32> to vector<8x64xbf16>
    %11 = arith.index_cast %1 : i32 to index
    %c0_5 = arith.constant 0 : index
    %12 = vector.load %arg4[%11, %c0_5] : memref<8x32xf32, #tpu.memory_space<vmem>>, vector<8x32xf32>
    %13 = arith.truncf %12 : vector<8x32xf32> to vector<8x32xbf16>
    %14 = arith.index_cast %3 : i32 to index
    %c0_6 = arith.constant 0 : index
    %15 = vector.load %arg3[%14, %c0_6] : memref<8x64xf32, #tpu.memory_space<vmem>>, vector<8x64xf32>
    %16 = arith.truncf %15 : vector<8x64xf32> to vector<8x64xbf16>
    %17 = arith.index_cast %3 : i32 to index
    %c0_7 = arith.constant 0 : index
    %18 = vector.load %arg4[%17, %c0_7] : memref<8x32xf32, #tpu.memory_space<vmem>>, vector<8x32xf32>
    %19 = arith.truncf %18 : vector<8x32xf32> to vector<8x32xbf16>
    %c0_i32 = arith.constant 0 : i32
    %20 = arith.cmpi eq, %arg1, %c0_i32 : i32
    %21 = arith.extui %20 : i1 to i32
    %c0_i32_8 = arith.constant 0 : i32
    %22 = arith.cmpi ne, %21, %c0_i32_8 : i32
    scf.if %22 {
      %cst_32 = arith.constant dense<0.000000e+00> : vector<8x8xf32>
      %70 = tpu.matmul %10, %5, %cst_32 {dimension_numbers = #tpu.dot_dimension_numbers<[1], [1], [0], [0], [0, 0, 1, 0], [], []>} : vector<8x64xbf16>, vector<8x64xbf16>, vector<8x8xf32> -> vector<8x8xf32>
      %cst_33 = arith.constant dense<0.000000e+00> : vector<8x8xf32>
      %71 = tpu.matmul %13, %7, %cst_33 {dimension_numbers = #tpu.dot_dimension_numbers<[1], [1], [0], [0], [0, 0, 1, 0], [], []>} : vector<8x32xbf16>, vector<8x32xbf16>, vector<8x8xf32> -> vector<8x8xf32>
      %cst_34 = arith.constant dense<0xFF800000> : vector<8xf32>
      %72 = vector.multi_reduction <maximumf>, %70, %cst_34 [1] : vector<8x8xf32> to vector<8xf32>
      %73 = vector.shape_cast %72 : vector<8xf32> to vector<8x1xf32>
      %cst_35 = arith.constant dense<0xFF800000> : vector<8xf32>
      %74 = vector.multi_reduction <maximumf>, %71, %cst_35 [1] : vector<8x8xf32> to vector<8xf32>
      %75 = vector.shape_cast %74 : vector<8xf32> to vector<8x1xf32>
      %76 = vector.broadcast %73 : vector<8x1xf32> to vector<8x8xf32>
      %77 = arith.subf %70, %76 : vector<8x8xf32>
      %78 = math.exp %77 : vector<8x8xf32>
      %cst_36 = arith.constant dense<0.000000e+00> : vector<8xf32>
      %79 = vector.multi_reduction <add>, %78, %cst_36 [1] : vector<8x8xf32> to vector<8xf32>
      %80 = vector.shape_cast %79 : vector<8xf32> to vector<8x1xf32>
      %81 = math.log %80 : vector<8x1xf32>
      %82 = arith.addf %73, %81 : vector<8x1xf32>
      %c0_37 = arith.constant 0 : index
      %c0_38 = arith.constant 0 : index
      %83 = vector.load %arg10[%c0_37, %c0_38] : memref<8x1xf32, #tpu.memory_space<vmem>>, vector<8x1xf32>
      tpu.vector_store %arg10[%c0_37, %c0_38], %82 {strides = array<i32>} : memref<8x1xf32, #tpu.memory_space<vmem>>, vector<8x1xf32>,
      %84 = vector.broadcast %75 : vector<8x1xf32> to vector<8x8xf32>
      %85 = arith.subf %71, %84 : vector<8x8xf32>
      %86 = math.exp %85 : vector<8x8xf32>
      %cst_39 = arith.constant dense<0.000000e+00> : vector<8xf32>
      %87 = vector.multi_reduction <add>, %86, %cst_39 [1] : vector<8x8xf32> to vector<8xf32>
      %88 = vector.shape_cast %87 : vector<8xf32> to vector<8x1xf32>
      %89 = math.log %88 : vector<8x1xf32>
      %90 = arith.addf %75, %89 : vector<8x1xf32>
      %c0_40 = arith.constant 0 : index
      %c0_41 = arith.constant 0 : index
      %91 = vector.load %arg11[%c0_40, %c0_41] : memref<8x1xf32, #tpu.memory_space<vmem>>, vector<8x1xf32>
      tpu.vector_store %arg11[%c0_40, %c0_41], %90 {strides = array<i32>} : memref<8x1xf32, #tpu.memory_space<vmem>>, vector<8x1xf32>,
      %cst_42 = arith.constant 0.000000e+00 : f32
      %92 = vector.broadcast %cst_42 : f32 to vector<8x8xf32>
      %c0_43 = arith.constant 0 : index
      %c0_44 = arith.constant 0 : index
      %93 = vector.load %arg12[%c0_43, %c0_44] : memref<8x8xf32, #tpu.memory_space<vmem>>, vector<8x8xf32>
      tpu.vector_store %arg12[%c0_43, %c0_44], %92 {strides = array<i32>} : memref<8x8xf32, #tpu.memory_space<vmem>>, vector<8x8xf32>,
      %cst_45 = arith.constant 0.000000e+00 : f32
      %94 = vector.broadcast %cst_45 : f32 to vector<8x8xf32>
      %c0_46 = arith.constant 0 : index
      %c0_47 = arith.constant 0 : index
      %95 = vector.load %arg13[%c0_46, %c0_47] : memref<8x8xf32, #tpu.memory_space<vmem>>, vector<8x8xf32>
      tpu.vector_store %arg13[%c0_46, %c0_47], %94 {strides = array<i32>} : memref<8x8xf32, #tpu.memory_space<vmem>>, vector<8x8xf32>,
    } else {
    }
    %cst = arith.constant dense<0.000000e+00> : vector<8x8xf32>
    %23 = tpu.matmul %10, %16, %cst {dimension_numbers = #tpu.dot_dimension_numbers<[1], [1], [0], [0], [0, 0, 1, 0], [], []>} : vector<8x64xbf16>, vector<8x64xbf16>, vector<8x8xf32> -> vector<8x8xf32>
    %cst_9 = arith.constant dense<0.000000e+00> : vector<8x8xf32>
    %24 = tpu.matmul %13, %19, %cst_9 {dimension_numbers = #tpu.dot_dimension_numbers<[1], [1], [0], [0], [0, 0, 1, 0], [], []>} : vector<8x32xbf16>, vector<8x32xbf16>, vector<8x8xf32> -> vector<8x8xf32>
    %c0_10 = arith.constant 0 : index
    %c0_11 = arith.constant 0 : index
    %25 = vector.load %arg10[%c0_10, %c0_11] : memref<8x1xf32, #tpu.memory_space<vmem>>, vector<8x1xf32>
    %26 = vector.broadcast %25 : vector<8x1xf32> to vector<8x8xf32>
    %27 = arith.subf %23, %26 : vector<8x8xf32>
    %28 = math.exp %27 : vector<8x8xf32>
    %c0_12 = arith.constant 0 : index
    %c0_13 = arith.constant 0 : index
    %29 = vector.load %arg11[%c0_12, %c0_13] : memref<8x1xf32, #tpu.memory_space<vmem>>, vector<8x1xf32>
    %30 = vector.broadcast %29 : vector<8x1xf32> to vector<8x8xf32>
    %31 = arith.subf %24, %30 : vector<8x8xf32>
    %32 = math.exp %31 : vector<8x8xf32>
    %cst_14 = arith.constant dense<0.000000e+00> : vector<8x8xf32>
    %33 = tpu.matmul %16, %5, %cst_14 {dimension_numbers = #tpu.dot_dimension_numbers<[1], [1], [0], [0], [0, 0, 1, 0], [], []>} : vector<8x64xbf16>, vector<8x64xbf16>, vector<8x8xf32> -> vector<8x8xf32>
    %cst_15 = arith.constant dense<0.000000e+00> : vector<8x8xf32>
    %34 = tpu.matmul %19, %7, %cst_15 {dimension_numbers = #tpu.dot_dimension_numbers<[1], [1], [0], [0], [0, 0, 1, 0], [], []>} : vector<8x32xbf16>, vector<8x32xbf16>, vector<8x8xf32> -> vector<8x8xf32>
    %cst_16 = arith.constant dense<0xFF800000> : vector<8xf32>
    %35 = vector.multi_reduction <maximumf>, %33, %cst_16 [1] : vector<8x8xf32> to vector<8xf32>
    %36 = vector.shape_cast %35 : vector<8xf32> to vector<8x1xf32>
    %37 = vector.broadcast %36 : vector<8x1xf32> to vector<8x8xf32>
    %38 = arith.subf %33, %37 : vector<8x8xf32>
    %39 = math.exp %38 : vector<8x8xf32>
    %cst_17 = arith.constant dense<0.000000e+00> : vector<8xf32>
    %40 = vector.multi_reduction <add>, %39, %cst_17 [1] : vector<8x8xf32> to vector<8xf32>
    %41 = vector.shape_cast %40 : vector<8xf32> to vector<8x1xf32>
    %42 = tpu.reciprocal %41 {approx = true} : vector<8x1xf32> -> vector<8x1xf32>
    %43 = vector.broadcast %42 : vector<8x1xf32> to vector<8x8xf32>
    %44 = arith.mulf %39, %43 : vector<8x8xf32>
    %cst_18 = arith.constant dense<0xFF800000> : vector<8xf32>
    %45 = vector.multi_reduction <maximumf>, %34, %cst_18 [1] : vector<8x8xf32> to vector<8xf32>
    %46 = vector.shape_cast %45 : vector<8xf32> to vector<8x1xf32>
    %47 = vector.broadcast %46 : vector<8x1xf32> to vector<8x8xf32>
    %48 = arith.subf %34, %47 : vector<8x8xf32>
    %49 = math.exp %48 : vector<8x8xf32>
    %cst_19 = arith.constant dense<0.000000e+00> : vector<8xf32>
    %50 = vector.multi_reduction <add>, %49, %cst_19 [1] : vector<8x8xf32> to vector<8xf32>
    %51 = vector.shape_cast %50 : vector<8xf32> to vector<8x1xf32>
    %52 = tpu.reciprocal %51 {approx = true} : vector<8x1xf32> -> vector<8x1xf32>
    %53 = vector.broadcast %52 : vector<8x1xf32> to vector<8x8xf32>
    %54 = arith.mulf %49, %53 : vector<8x8xf32>
    %c0_20 = arith.constant 0 : index
    %c0_21 = arith.constant 0 : index
    %55 = vector.load %arg12[%c0_20, %c0_21] : memref<8x8xf32, #tpu.memory_space<vmem>>, vector<8x8xf32>
    %56 = arith.truncf %28 : vector<8x8xf32> to vector<8x8xbf16>
    %57 = arith.truncf %54 : vector<8x8xf32> to vector<8x8xbf16>
    %cst_22 = arith.constant dense<0.000000e+00> : vector<8x8xf32>
    %58 = tpu.matmul %56, %57, %cst_22 {dimension_numbers = #tpu.dot_dimension_numbers<[1], [0], [0], [1], [0, 0, 1, 1], [], []>} : vector<8x8xbf16>, vector<8x8xbf16>, vector<8x8xf32> -> vector<8x8xf32>
    %59 = arith.addf %55, %58 : vector<8x8xf32>
    %c0_23 = arith.constant 0 : index
    %c0_24 = arith.constant 0 : index
    %60 = vector.load %arg12[%c0_23, %c0_24] : memref<8x8xf32, #tpu.memory_space<vmem>>, vector<8x8xf32>
    tpu.vector_store %arg12[%c0_23, %c0_24], %59 {strides = array<i32>} : memref<8x8xf32, #tpu.memory_space<vmem>>, vector<8x8xf32>,
    %c0_25 = arith.constant 0 : index
    %c0_26 = arith.constant 0 : index
    %61 = vector.load %arg13[%c0_25, %c0_26] : memref<8x8xf32, #tpu.memory_space<vmem>>, vector<8x8xf32>
    %62 = arith.truncf %32 : vector<8x8xf32> to vector<8x8xbf16>
    %63 = arith.truncf %44 : vector<8x8xf32> to vector<8x8xbf16>
    %cst_27 = arith.constant dense<0.000000e+00> : vector<8x8xf32>
    %64 = tpu.matmul %62, %63, %cst_27 {dimension_numbers = #tpu.dot_dimension_numbers<[1], [0], [0], [1], [0, 0, 1, 1], [], []>} : vector<8x8xbf16>, vector<8x8xbf16>, vector<8x8xf32> -> vector<8x8xf32>
    %65 = arith.addf %61, %64 : vector<8x8xf32>
    %c0_28 = arith.constant 0 : index
    %c0_29 = arith.constant 0 : index
    %66 = vector.load %arg13[%c0_28, %c0_29] : memref<8x8xf32, #tpu.memory_space<vmem>>, vector<8x8xf32>
    tpu.vector_store %arg13[%c0_28, %c0_29], %65 {strides = array<i32>} : memref<8x8xf32, #tpu.memory_space<vmem>>, vector<8x8xf32>,
    %c0_i32_30 = arith.constant 0 : i32
    %67 = arith.cmpi eq, %arg1, %c0_i32_30 : i32
    %68 = arith.extui %67 : i1 to i32
    %c0_i32_31 = arith.constant 0 : i32
    %69 = arith.cmpi ne, %68, %c0_i32_31 : i32
    scf.if %69 {
      %70 = arith.index_cast %1 : i32 to index
      %c0_32 = arith.constant 0 : index
      %71 = vector.load %arg3[%70, %c0_32] : memref<8x64xf32, #tpu.memory_space<vmem>>, vector<8x64xf32>
      %72 = arith.index_cast %1 : i32 to index
      %c0_33 = arith.constant 0 : index
      %73 = vector.load %arg4[%72, %c0_33] : memref<8x32xf32, #tpu.memory_space<vmem>>, vector<8x32xf32>
      %74 = arith.index_cast %1 : i32 to index
      %c0_34 = arith.constant 0 : index
      %75 = vector.load %arg2[%74, %c0_34] : memref<8x10xf32, #tpu.memory_space<vmem>>, vector<8x10xf32>
      %c0_35 = arith.constant 0 : index
      %c0_36 = arith.constant 0 : index
      %76 = vector.load %arg5[%c0_35, %c0_36] : memref<10x64xf32, #tpu.memory_space<vmem>>, vector<10x64xf32>
      %c0_37 = arith.constant 0 : index
      %c0_38 = arith.constant 0 : index
      %77 = vector.load %arg6[%c0_37, %c0_38] : memref<10x32xf32, #tpu.memory_space<vmem>>, vector<10x32xf32>
      %78 = tpu.iota {dimensions = array<i32: 1>} : vector<8x10xi32>
      %cst_39 = arith.constant dense<0xFF800000> : vector<8xf32>
      %79 = vector.multi_reduction <maximumf>, %75, %cst_39 [1] : vector<8x10xf32> to vector<8xf32>
      %80 = vector.shape_cast %79 : vector<8xf32> to vector<8x1xf32>
      %81 = vector.broadcast %80 : vector<8x1xf32> to vector<8x10xf32>
      %82 = arith.cmpf oeq, %75, %81 : vector<8x10xf32>
      %c10_i32 = arith.constant 10 : i32
      %83 = vector.broadcast %c10_i32 : i32 to vector<8x10xi32>
      %84 = arith.select %82, %78, %83 : vector<8x10xi1>, vector<8x10xi32>
      %cst_40 = arith.constant dense<2147483647> : vector<8xi32>
      %85 = vector.multi_reduction <minsi>, %84, %cst_40 [1] : vector<8x10xi32> to vector<8xi32>
      %86 = vector.shape_cast %85 : vector<8xi32> to vector<8x1xi32>
      %87 = vector.broadcast %86 : vector<8x1xi32> to vector<8x10xi32>
      %88 = arith.cmpi eq, %78, %87 : vector<8x10xi32>
      %89 = arith.extui %88 : vector<8x10xi1> to vector<8x10xi32>
      %90 = arith.sitofp %89 : vector<8x10xi32> to vector<8x10xf32>
      %cst_41 = arith.constant dense<0.000000e+00> : vector<8x64xf32>
      %91 = tpu.matmul %90, %76, %cst_41 {dimension_numbers = #tpu.dot_dimension_numbers<[1], [0], [0], [1], [0, 0, 1, 1], [], []>} : vector<8x10xf32>, vector<10x64xf32>, vector<8x64xf32> -> vector<8x64xf32>
      %cst_42 = arith.constant dense<0.000000e+00> : vector<8x32xf32>
      %92 = tpu.matmul %90, %77, %cst_42 {dimension_numbers = #tpu.dot_dimension_numbers<[1], [0], [0], [1], [0, 0, 1, 1], [], []>} : vector<8x10xf32>, vector<10x32xf32>, vector<8x32xf32> -> vector<8x32xf32>
      %93 = arith.mulf %91, %71 : vector<8x64xf32>
      %cst_43 = arith.constant 1.000000e+00 : f32
      %94 = vector.broadcast %cst_43 : f32 to vector<8x64xf32>
      %95 = arith.addf %94, %93 : vector<8x64xf32>
      %cst_44 = arith.constant 5.000000e-01 : f32
      %96 = vector.broadcast %cst_44 : f32 to vector<8x64xf32>
      %97 = arith.mulf %96, %95 : vector<8x64xf32>
      %98 = math.log %97 : vector<8x64xf32>
      %cst_45 = arith.constant -1.000000e+02 : f32
      %99 = vector.broadcast %cst_45 : f32 to vector<8x64xf32>
      %100 = arith.maximumf %98, %99 : vector<8x64xf32>
      %cst_46 = arith.constant 0.000000e+00 : f32
      %101 = vector.broadcast %cst_46 : f32 to vector<8x64xf32>
      %102 = arith.subf %101, %100 : vector<8x64xf32>
      %103 = arith.mulf %92, %73 : vector<8x32xf32>
      %cst_47 = arith.constant 1.000000e+00 : f32
      %104 = vector.broadcast %cst_47 : f32 to vector<8x32xf32>
      %105 = arith.addf %104, %103 : vector<8x32xf32>
      %cst_48 = arith.constant 5.000000e-01 : f32
      %106 = vector.broadcast %cst_48 : f32 to vector<8x32xf32>
      %107 = arith.mulf %106, %105 : vector<8x32xf32>
      %108 = math.log %107 : vector<8x32xf32>
      %cst_49 = arith.constant -1.000000e+02 : f32
      %109 = vector.broadcast %cst_49 : f32 to vector<8x32xf32>
      %110 = arith.maximumf %108, %109 : vector<8x32xf32>
      %cst_50 = arith.constant 0.000000e+00 : f32
      %111 = vector.broadcast %cst_50 : f32 to vector<8x32xf32>
      %112 = arith.subf %111, %110 : vector<8x32xf32>
      %cst_51 = arith.constant 0.000000e+00 : f32
      %113 = vector.broadcast %cst_51 : f32 to vector<8x64xf32>
      %114 = arith.subf %113, %102 : vector<8x64xf32>
      %cst_52 = arith.constant 3.200000e+01 : f32
      %115 = vector.broadcast %cst_52 : f32 to vector<8x64xf32>
      %116 = arith.divf %114, %115 : vector<8x64xf32>
      %117 = math.exp %116 : vector<8x64xf32>
      %118 = arith.mulf %102, %117 : vector<8x64xf32>
      %cst_53 = arith.constant 0.000000e+00 : f32
      %119 = vector.broadcast %cst_53 : f32 to vector<8x32xf32>
      %120 = arith.subf %119, %112 : vector<8x32xf32>
      %cst_54 = arith.constant 3.200000e+01 : f32
      %121 = vector.broadcast %cst_54 : f32 to vector<8x32xf32>
      %122 = arith.divf %120, %121 : vector<8x32xf32>
      %123 = math.exp %122 : vector<8x32xf32>
      %124 = arith.mulf %112, %123 : vector<8x32xf32>
      %cst_55 = arith.constant 5.000000e-01 : f32
      %125 = vector.broadcast %cst_55 : f32 to vector<8x64xf32>
      %126 = arith.mulf %125, %118 : vector<8x64xf32>
      %127 = math.absf %71 : vector<8x64xf32>
      %cst_56 = arith.constant 1.000000e+00 : f32
      %128 = vector.broadcast %cst_56 : f32 to vector<8x64xf32>
      %129 = arith.subf %127, %128 : vector<8x64xf32>
      %130 = arith.mulf %129, %129 : vector<8x64xf32>
      %cst_57 = arith.constant 9.99999974E-5 : f32
      %131 = vector.broadcast %cst_57 : f32 to vector<8x64xf32>
      %132 = arith.mulf %131, %130 : vector<8x64xf32>
      %133 = arith.addf %126, %132 : vector<8x64xf32>
      %134 = math.absf %73 : vector<8x32xf32>
      %cst_58 = arith.constant 1.000000e+00 : f32
      %135 = vector.broadcast %cst_58 : f32 to vector<8x32xf32>
      %136 = arith.subf %134, %135 : vector<8x32xf32>
      %137 = arith.mulf %136, %136 : vector<8x32xf32>
      %cst_59 = arith.constant 9.99999974E-5 : f32
      %138 = vector.broadcast %cst_59 : f32 to vector<8x32xf32>
      %139 = arith.mulf %138, %137 : vector<8x32xf32>
      %140 = arith.addf %124, %139 : vector<8x32xf32>
      %c0_60 = arith.constant 0 : index
      %c0_61 = arith.constant 0 : index
      %141 = vector.load %arg12[%c0_60, %c0_61] : memref<8x8xf32, #tpu.memory_space<vmem>>, vector<8x8xf32>
      %c0_62 = arith.constant 0 : index
      %c0_63 = arith.constant 0 : index
      %142 = vector.load %arg13[%c0_62, %c0_63] : memref<8x8xf32, #tpu.memory_space<vmem>>, vector<8x8xf32>
      %143 = arith.subf %141, %142 : vector<8x8xf32>
      %cst_64 = arith.constant dense<0.000000e+00> : vector<8xf32>
      %144 = vector.multi_reduction <add>, %133, %cst_64 [1] : vector<8x64xf32> to vector<8xf32>
      %145 = vector.shape_cast %144 : vector<8xf32> to vector<8x1xf32>
      %cst_65 = arith.constant dense<0.000000e+00> : vector<1xf32>
      %146 = vector.multi_reduction <add>, %145, %cst_65 [0] : vector<8x1xf32> to vector<1xf32>
      %147 = vector.shape_cast %146 : vector<1xf32> to vector<1x1xf32>
      %cst_66 = arith.constant 0.001953125 : f32
      %148 = vector.broadcast %cst_66 : f32 to vector<1x1xf32>
      %149 = arith.mulf %147, %148 : vector<1x1xf32>
      %cst_67 = arith.constant dense<0.000000e+00> : vector<8xf32>
      %150 = vector.multi_reduction <add>, %140, %cst_67 [1] : vector<8x32xf32> to vector<8xf32>
      %151 = vector.shape_cast %150 : vector<8xf32> to vector<8x1xf32>
      %cst_68 = arith.constant dense<0.000000e+00> : vector<1xf32>
      %152 = vector.multi_reduction <add>, %151, %cst_68 [0] : vector<8x1xf32> to vector<1xf32>
      %153 = vector.shape_cast %152 : vector<1xf32> to vector<1x1xf32>
      %cst_69 = arith.constant 3.906250e-03 : f32
      %154 = vector.broadcast %cst_69 : f32 to vector<1x1xf32>
      %155 = arith.mulf %153, %154 : vector<1x1xf32>
      %156 = arith.addf %149, %155 : vector<1x1xf32>
      %157 = arith.mulf %143, %143 : vector<8x8xf32>
      %cst_70 = arith.constant dense<0.000000e+00> : vector<8xf32>
      %158 = vector.multi_reduction <add>, %157, %cst_70 [1] : vector<8x8xf32> to vector<8xf32>
      %159 = vector.shape_cast %158 : vector<8xf32> to vector<8x1xf32>
      %cst_71 = arith.constant dense<0.000000e+00> : vector<1xf32>
      %160 = vector.multi_reduction <add>, %159, %cst_71 [0] : vector<8x1xf32> to vector<1xf32>
      %161 = vector.shape_cast %160 : vector<1xf32> to vector<1x1xf32>
      %cst_72 = arith.constant 1.562500e-02 : f32
      %162 = vector.broadcast %cst_72 : f32 to vector<1x1xf32>
      %163 = arith.mulf %161, %162 : vector<1x1xf32>
      %164 = arith.addf %156, %163 : vector<1x1xf32>
      %c0_73 = arith.constant 0 : index
      %c0_74 = arith.constant 0 : index
      %c0_75 = arith.constant 0 : index
      %165 = vector.load %arg9[%c0_73, %c0_74, %c0_75] : memref<1x1x1xf32, #tpu.memory_space<vmem>>, vector<1x1x1xf32>
      %166 = vector.shape_cast %165 : vector<1x1x1xf32> to vector<1x1xf32>
      %167 = vector.shape_cast %164 : vector<1x1xf32> to vector<1x1x1xf32>
      tpu.vector_store %arg9[%c0_73, %c0_74, %c0_75], %167 {strides = array<i32>} : memref<1x1x1xf32, #tpu.memory_space<vmem>>, vector<1x1x1xf32>,
    } else {
    }
    return
  }
  func.func @transform_0(%arg0: i32, %arg1: i32) -> (i32, i32) {
    %c0_i32 = arith.constant 0 : i32
    %c0_i32_0 = arith.constant 0 : i32
    %c0_i32_1 = arith.constant 0 : i32
    return %c0_i32, %c0_i32_0 : i32, i32
  }
  func.func @transform_1(%arg0: i32, %arg1: i32) -> (i32, i32) {
    %c0_i32 = arith.constant 0 : i32
    %c0_i32_0 = arith.constant 0 : i32
    %c0_i32_1 = arith.constant 0 : i32
    return %c0_i32, %c0_i32_0 : i32, i32
  }
  func.func @transform_2(%arg0: i32, %arg1: i32) -> (i32, i32) {
    %c0_i32 = arith.constant 0 : i32
    %c0_i32_0 = arith.constant 0 : i32
    %c0_i32_1 = arith.constant 0 : i32
    return %c0_i32, %c0_i32_0 : i32, i32
  }
  func.func @transform_3(%arg0: i32, %arg1: i32) -> (i32, i32) {
    %c0_i32 = arith.constant 0 : i32
    %c0_i32_0 = arith.constant 0 : i32
    %c0_i32_1 = arith.constant 0 : i32
    return %c0_i32, %c0_i32_0 : i32, i32
  }
  func.func @transform_4(%arg0: i32, %arg1: i32) -> (i32, i32) {
    %c0_i32 = arith.constant 0 : i32
    %c0_i32_0 = arith.constant 0 : i32
    %c0_i32_1 = arith.constant 0 : i32
    return %c0_i32, %c0_i32_0 : i32, i32
  }
  func.func @transform_5(%arg0: i32, %arg1: i32) -> (i32, i32) {
    %c0_i32 = arith.constant 0 : i32
    %c0_i32_0 = arith.constant 0 : i32
    %c0_i32_1 = arith.constant 0 : i32
    return %c0_i32, %c0_i32_0 : i32, i32
  }
  func.func @transform_6(%arg0: i32, %arg1: i32) -> (i32, i32) {
    %c0_i32 = arith.constant 0 : i32
    %c0_i32_0 = arith.constant 0 : i32
    %c0_i32_1 = arith.constant 0 : i32
    return %c0_i32, %c0_i32_0 : i32, i32
  }
  func.func @transform_7(%arg0: i32, %arg1: i32) -> (i32, i32, i32) {
    %c0_i32 = arith.constant 0 : i32
    %c0_i32_0 = arith.constant 0 : i32
    %c0_i32_1 = arith.constant 0 : i32
    return %arg0, %c0_i32, %c0_i32_0 : i32, i32, i32
  }
}

</mosaic_0001>

<bundles_post_ra>
// kernel: _dhmi_forward.1
= control target key start
LH: loop header
LB: loop body
LE: loop exit
PB: predicated region body
PF: predicated region fallthrough
CT: control target
= control target key end

     0   :  { %12 = vsyncpa [#allocation7], 0  ;;  %s1356_s0 = inlined_call_operand.hbm [shape: f32[8,10], index: 0, kind: input, shape index: {}]   ;;  %s1357_s1 = inlined_call_operand.hbm [shape: f32[8,64], index: 1, kind: input, shape index: {}]   ;;  %s1358_s2 = inlined_call_operand.hbm [shape: f32[8,32], index: 2, kind: input, shape index: {}]   ;;  %s1359_s3 = inlined_call_operand.hbm [shape: f32[10,64], index: 3, kind: input, shape index: {}]   ;;  %s1360_s4 = inlined_call_operand.hbm [shape: f32[10,32], index: 4, kind: input, shape index: {}]   ;;  %s1361_s5 = inlined_call_operand.vmem [shape: f32[1,64], index: 5, kind: input, shape index: {}]   ;;  %s1362_s6 = inlined_call_operand.vmem [shape: f32[1,32], index: 6, kind: input, shape index: {}]   ;;  %s1363_s7 = inlined_call_operand.hbm [shape: f32[1,1,1], index: 7, kind: output, shape index: {}]  }
   0x1   :  { %13 = vsyncpa [#allocation10], 0 }
   0x2   :  { %14 = vsyncpa [#allocation13], 0 }
   0x3   :  { %15 = vsyncpa [#allocation8], 0  ;;  %s1128_s24 = smov [#allocation9]   ;;  %s1129_s26 = smov [#allocation12]  }
   0x4   :  { %s32_s25 = sshll.u32 %s1128_s24, 4  ;;  %s51_s27 = sshll.u32 %s1129_s26, 4  ;;  %s33_s25 = int_to_ptr.vmem [resolvable:$true] %s32_s25  ;;  %s1181_s27 = int_to_ptr.vmem [resolvable:$true] %s51_s27 }
   0x5   :  { %s988_s5 = scalar_lea.hbm %s1357_s1, 128 }
   0x6   :  { %p989_p0 = scmp.ne.s32.totalorder %s1357_s1, %s988_s5  ;;  %p992_p1 = scmp.lt.u32.totalorder %s988_s5, %s1357_s1 }
   0x8   :  { %p994_p2 = pnand %p992_p1, %p989_p0 }
   0xa   :  { %997 = shalt.err (!%p994_p2)
}
   0xb   :  { %s998_s10 = scalar_lea.vmem %s33_s25, 128  ;;  %p1003_p4 = scmp.lt.s32.totalorder %s33_s25, %s33_s25 }
   0xc   :  { %p999_p3 = scmp.ne.s32.totalorder %s33_s25, %s998_s10  ;;  %p1004_p5 = scmp.lt.s32.totalorder %s998_s10, %s998_s10 }
   0xe   :  { %p1005_p6 = por %p1004_p5, %p1003_p4 }
  0x10   :  { %p1006_p7 = pnand %p1005_p6, %p999_p3 }
  0x12   :  { %1009 = shalt.err (!%p1006_p7)
}
  0x13   :  { %35 = dma.hbm_to_vmem [thread:$0]  %s1357_s1, 128, %s33_s25, [#allocation10]  }
  0x14   :  { %s1010_s15 = scalar_lea.hbm %s1359_s3, 256 }
  0x15   :  { %p1011_p8 = scmp.ne.s32.totalorder %s1359_s3, %s1010_s15  ;;  %p1014_p9 = scmp.lt.u32.totalorder %s1010_s15, %s1359_s3 }
  0x17   :  { %p1016_p10 = pnand %p1014_p9, %p1011_p8 }
  0x19   :  { %1019 = shalt.err (!%p1016_p10)
}
  0x1a   :  { %s1020_s20 = scalar_lea.vmem %s1181_s27, 256  ;;  %p1025_p12 = scmp.lt.s32.totalorder %s1181_s27, %s1181_s27 }
  0x1b   :  { %p1021_p11 = scmp.ne.s32.totalorder %s1181_s27, %s1020_s20  ;;  %p1026_p13 = scmp.lt.s32.totalorder %s1020_s20, %s1020_s20 }
  0x1d   :  { %p1027_p0 = por %p1026_p13, %p1025_p12 }
  0x1f   :  { %p1028_p1 = pnand %p1027_p0, %p1021_p11 }
  0x21   :  { %1031 = shalt.err (!%p1028_p1)
}
  0x22   :  { %s1130_s1 = smov 128   ;;  %s1131_s21 = smov 8  }
  0x23   :  { %57 = dma.hbm_to_vmem [thread:$0]  %s1359_s3, 256, %s1181_s27, [#allocation13], %s1130_s1, %s1130_s1, %s1131_s21  }
  0x24   :  { %s1132_s24 = smov [#allocation6]   ;;  %s1133_s26 = smov [#allocation11]  }
  0x25   :  { %s22_s25 = sshll.u32 %s1132_s24, 4  ;;  %s42_s28 = sshll.u32 %s1133_s26, 4  ;;  %s23_s25 = int_to_ptr.vmem [resolvable:$true] %s22_s25  ;;  %s43_s28 = int_to_ptr.vmem [resolvable:$true] %s42_s28 }
  0x26   :  { %s1032_s30 = scalar_lea.hbm %s1356_s0, 128 }
  0x27   :  { %p1033_p2 = scmp.ne.s32.totalorder %s1356_s0, %s1032_s30  ;;  %p1036_p3 = scmp.lt.u32.totalorder %s1032_s30, %s1356_s0 }
  0x29   :  { %p1038_p4 = pnand %p1036_p3, %p1033_p2 }
  0x2b   :  { %1041 = shalt.err (!%p1038_p4)
}
  0x2c   :  { %s1042_s3 = scalar_lea.vmem %s23_s25, 128  ;;  %p1047_p6 = scmp.lt.s32.totalorder %s23_s25, %s23_s25 }
  0x2d   :  { %p1043_p5 = scmp.ne.s32.totalorder %s23_s25, %s1042_s3  ;;  %p1048_p7 = scmp.lt.s32.totalorder %s1042_s3, %s1042_s3 }
  0x2f   :  { %p1049_p8 = por %p1048_p7, %p1047_p6 }
  0x31   :  { %p1050_p9 = pnand %p1049_p8, %p1043_p5 }
  0x33   :  { %1053 = shalt.err (!%p1050_p9)
}
  0x34   :  { %25 = dma.hbm_to_vmem [thread:$0]  %s1356_s0, 128, %s23_s25, [#allocation7]  }
  0x35   :  { %s1054_s14 = scalar_lea.hbm %s1358_s2, 128 }
  0x36   :  { %p1055_p10 = scmp.ne.s32.totalorder %s1358_s2, %s1054_s14  ;;  %p1058_p11 = scmp.lt.u32.totalorder %s1054_s14, %s1358_s2 }
  0x38   :  { %p1060_p12 = pnand %p1058_p11, %p1055_p10 }
  0x3a   :  { %1063 = shalt.err (!%p1060_p12)
}
  0x3b   :  { %s1064_s19 = scalar_lea.vmem %s43_s28, 128  ;;  %p1069_p0 = scmp.lt.s32.totalorder %s43_s28, %s43_s28 }
  0x3c   :  { %p1065_p13 = scmp.ne.s32.totalorder %s43_s28, %s1064_s19  ;;  %p1070_p1 = scmp.lt.s32.totalorder %s1064_s19, %s1064_s19 }
  0x3e   :  { %p1071_p2 = por %p1070_p1, %p1069_p0 }
  0x40   :  { %p1072_p3 = pnand %p1071_p2, %p1065_p13 }
  0x42   :  { %1075 = shalt.err (!%p1072_p3)
}
  0x43   :  { %45 = dma.hbm_to_vmem [thread:$0]  %s1358_s2, 128, %s43_s28, [#allocation10]  }
  0x44   :  { %s1134_s22 = smov [#allocation14]   ;;  %s1076_s26 = scalar_lea.hbm %s1360_s4, 256 }
  0x45   :  { %s63_s23 = sshll.u32 %s1134_s22, 4  ;;  %p1077_p4 = scmp.ne.s32.totalorder %s1360_s4, %s1076_s26  ;;  %s64_s23 = int_to_ptr.vmem [resolvable:$true] %s63_s23 }
  0x46   :  { %p1080_p5 = scmp.lt.u32.totalorder %s1076_s26, %s1360_s4 }
  0x48   :  { %p1082_p6 = pnand %p1080_p5, %p1077_p4 }
  0x4a   :  { %1085 = shalt.err (!%p1082_p6)
}
  0x4b   :  { %s1086_s8 = scalar_lea.vmem %s64_s23, 256  ;;  %p1091_p8 = scmp.lt.s32.totalorder %s64_s23, %s64_s23 }
  0x4c   :  { %p1087_p7 = scmp.ne.s32.totalorder %s64_s23, %s1086_s8  ;;  %p1092_p9 = scmp.lt.s32.totalorder %s1086_s8, %s1086_s8 }
  0x4e   :  { %p1093_p10 = por %p1092_p9, %p1091_p8 }
  0x50   :  { %p1094_p11 = pnand %p1093_p10, %p1087_p7 }
  0x52   :  { %1097 = shalt.err (!%p1094_p11)
}
  0x53   :  { %69 = dma.hbm_to_vmem [thread:$0]  %s1360_s4, 256, %s64_s23, [#allocation13], %s1130_s1, %s1130_s1, %s1131_s21  }
  0x54   :  { %1120 = dma.done.wait [#allocation7], 128  }
  0x55   :  { %1121 = vsyncadd [#allocation7], 4294967168 }
  0x56   :  { %1122 = dma.done.wait [#allocation10], 256  }
  0x57   :  { %1123 = vsyncadd [#allocation10], 4294967040 }
  0x58   :  { %1124 = dma.done.wait [#allocation13], 512  }
  0x59   :  { %1125 = vsyncadd [#allocation13], 4294966784  ;;  %v1135_v0 = vmov 0.0   ;;  %vm1136_vm0 = vmmov 0   ;;  %vm573_vm1 = vcmask 80896   ;;  %v1260_v1 = vld [vmem:[#allocation9] sm:$0xff]  ;;  %v571_v19 = vlaneseq }
  0x5a   :  { %875 = vmatprep.subr.bf16.mxu0 %v1135_v0  ;;  %881 = vmatprep.subr.bf16.mxu1 %v1135_v0  ;;  %vm112_vm2 = vcmask 523264   ;;  %v1262_v2 = vld [vmem:[#allocation11] sm:$0xff]  ;;  %vm159_vm3 = vcmask 261120   ;;  %v566_v3 = vld [vmem:[#allocation6] sm:$0xff]  ;;  %v93_v4 = vpack.c.bf16 %v1260_v1, %v1260_v1  ;;  %vm206_vm4 = vcmask 64512   ;;  %s1140_s4 = smov [#allocation15]  }
  0x5b   :  { %877 = vmatprep.mubr.msk.bf16.mxu0 %vm1136_vm0, %v1135_v0  ;;  %883 = vmatprep.mubr.msk.bf16.mxu1 %vm1136_vm0, %v1135_v0  ;;  %v95_v5 = vpack.c.bf16 %v1262_v2, %v1262_v2  ;;  %v574_v6 = vsel %vm573_vm1, %v566_v3, -inf  ;;  %234 = vst.msk [vmem:[#allocation4] sm:$0xff] %vm206_vm4, %v1135_v0  ;;  %235 = vst.msk [vmem:[#allocation5] sm:$0xff] %vm206_vm4, %v1135_v0  ;;  %v1305_v23 = vand.u32 127, %v571_v19  ;;  %vm222_vm6 = vcmask 7168   ;;  %s827_s1 = sshll.u32 %s1140_s4, 4  ;;  %s828_s1 = int_to_ptr.vmem [resolvable:$true] %s827_s1 }
  0x5c   :  { %575 = vmax.xlane.f32.xlu1 %v574_v6  ;;  %v117_v7 = vsel %vm112_vm2, %v93_v4, 0  ;;  %vm463_vm7 = vcmask 1043456   ;;  %vm600_vm9 = vcmask 1041408   ;;  %vm1139_vm10 = vmmov 1   ;;  %s1098_s21 = scalar_lea.vmem %s828_s1, 16  ;;  %s1102_s9 = scalar_lea.vmem %s828_s1, 32 }
  0x5d   :  { %v164_v8 = vsel %vm159_vm3, %v95_v5, 0  ;;  %876 = vmatpush3.bf16.xpose.msra.mxu0 %v117_v7  ;;  %vm939_vm11 = vmpackc.low %vm600_vm9, %vm1139_vm10  ;;  %vm819_vm13 = vcmask 0   ;;  %p1099_p12 = scmp.ne.s32.totalorder %s828_s1, %s1098_s21  ;;  %p1103_p13 = scmp.lt.s32.totalorder %s828_s1, %s828_s1 }
  0x5e   :  { %882 = vmatpush3.bf16.xpose.msra.mxu1 %v164_v8  ;;  %887 = vmatprep.subr.bf16.mxu0 %v1135_v0  ;;  %p1104_p0 = scmp.lt.s32.totalorder %s1102_s9, %s1098_s21 }
  0x5f   :  { %893 = vmatprep.subr.bf16.mxu1 %v1135_v0 }
  0x60   :  { %p1105_p1 = por %p1104_p0, %p1103_p13 }
  0x62   :  { %p1106_p2 = pnand %p1105_p1, %p1099_p12 }
  0x64   :  { %878 = vmatmul.mubr.msk.bf16.vlgmr.msra.gmra.mrb[0].mxu0 %vm112_vm2, %v93_v4 }
  0x65   :  { %884 = vmatmul.mubr.msk.bf16.vlgmr.msra.gmra.mrb[0].mxu1 %vm159_vm3, %v95_v5  ;;  %888 = vmatpush3.bf16.xpose.msra.mxu0 %v117_v7 }
  0x66   :  { %894 = vmatpush3.bf16.xpose.msra.mxu1 %v164_v8  ;;  %895 = vmatprep.mubr.msk.bf16.mxu1 %vm1136_vm0, %v1135_v0 }
  0x67   :  { %905 = vmatprep.subr.bf16.mxu1 %v1135_v0  ;;  %889 = vmatprep.mubr.msk.bf16.mxu0 %vm1136_vm0, %v1135_v0 }
  0x68   :  { %899 = vmatprep.subr.bf16.mxu0 %v1135_v0 }
  0x6c   :  { %890 = vmatmul.mubr.msk.bf16.vlgmr.msra.gmra.mrb[4].mxu0 %vm112_vm2, %v93_v4 }
  0x6d   :  { %896 = vmatmul.mubr.msk.bf16.vlgmr.msra.gmra.mrb[4].mxu1 %vm159_vm3, %v95_v5  ;;  %900 = vmatpush3.bf16.xpose.msra.mxu0 %v117_v7 }
  0x6e   :  { %906 = vmatpush3.bf16.xpose.msra.mxu1 %v164_v8  ;;  %907 = vmatprep.mubr.msk.bf16.mxu1 %vm1136_vm0, %v1135_v0 }
  0x6f   :  { %901 = vmatprep.mubr.msk.bf16.mxu0 %vm1136_vm0, %v1135_v0  ;;  %911 = vmatprep.subr.bf16.mxu0 %v1135_v0 }
  0x70   :  { %917 = vmatprep.subr.bf16.mxu1 %v1135_v0 }
  0x74   :  { %902 = vmatmul.mubr.msk.bf16.vlgmr.msra.gmra.mrb[8].mxu0 %vm112_vm2, %v93_v4 }
  0x75   :  { %908 = vmatmul.mubr.msk.bf16.vlgmr.msra.gmra.mrb[8].mxu1 %vm159_vm3, %v95_v5  ;;  %913 = vmatprep.mubr.msk.bf16.mxu0 %vm1136_vm0, %v1135_v0 }
  0x76   :  { %919 = vmatprep.mubr.msk.bf16.mxu1 %vm1136_vm0, %v1135_v0 }
  0xe9   :  { %v576_v20 = vpop.xlane.xlu1 %575 }
  0xea   :  { %vm577_vm5 = vcmp.eq.f32.partialorder %v566_v3, %v576_v20  ;;  %v1137_v3 = vmov 0  }
  0xeb   :  { %v578_v30 = vsel %vm577_vm5, %v1305_v23, 10  ;;  %958 = vset.pattern.permute.xlu0 %v1137_v3  ;;  %959 = vset.pattern.permute.xlu1 %v1137_v3 }
  0xec   :  { %v1309_v31 = vsel %vm573_vm1, %v578_v30, 2147483647 }
  0xed   :  { %v581_v37 = vshra.s32 %v1309_v31, 16 }
  0xef   :  { %v1314_v43 = vcvt.s32.f32 %v581_v37 }
 0x137   :  { %v153_v9 = vpop.f32.mrb[0].mxu0 }
 0x138   :  { %v200_v10 = vpop.f32.mrb[0].mxu1  ;;  %v879_v11 = vpop.f32.mrb[1].mxu0  ;;  %v207_v13 = vsel %vm206_vm4, %v153_v9, -inf }
 0x139   :  { %v885_v12 = vpop.f32.mrb[1].mxu1  ;;  %208 = vmax.xlane.f32.xlu0 %v207_v13  ;;  %v156_v14 = vpop.f32.mrb[2].mxu0  ;;  %v210_v18 = vsel %vm206_vm4, %v200_v10, -inf }
 0x13a   :  { %v203_v15 = vpop.f32.mrb[2].mxu1  ;;  %v880_v16 = vpop.f32.mrb[3].mxu0 }
 0x13b   :  { %v886_v17 = vpop.f32.mrb[3].mxu1 }
 0x13d   :  { %211 = vmax.xlane.f32.xlu0 %v210_v18 }
 0x13f   :  { %v1303_v22 = vpop.f32.mrb[4].mxu0 }
 0x140   :  { %v1301_v21 = vpop.f32.mrb[4].mxu1  ;;  %v891_v25 = vpop.f32.mrb[5].mxu0 }
 0x141   :  { %v897_v24 = vpop.f32.mrb[5].mxu1  ;;  %v280_v27 = vpop.f32.mrb[6].mxu0 }
 0x142   :  { %v327_v26 = vpop.f32.mrb[6].mxu1  ;;  %v892_v29 = vpop.f32.mrb[7].mxu0 }
 0x143   :  { %v898_v28 = vpop.f32.mrb[7].mxu1  ;;  %v580_v29 = vand.u32 65535, %v1309_v31 }
 0x144   :  { %v1138_v28 = vmov 0.0|0.0  }
 0x145   :  { %v582_v30 = vcvt.s32.f32 %v580_v29 }
 0x147   :  { %v385_v33 = vpop.f32.mrb[8].mxu0 }
 0x148   :  { %v428_v32 = vpop.f32.mrb[8].mxu1  ;;  %v903_v36 = vpop.f32.mrb[9].mxu0  ;;  %v435_v40 = vsel %vm206_vm4, %v385_v33, -inf }
 0x149   :  { %v446_v34 = vsel %vm206_vm4, %v428_v32, -inf  ;;  %v909_v35 = vpop.f32.mrb[9].mxu1  ;;  %v388_v39 = vpop.f32.mrb[10].mxu0 }
 0x14a   :  { %447 = vmax.xlane.f32.xlu1 %v446_v34  ;;  %v431_v38 = vpop.f32.mrb[10].mxu1  ;;  %v904_v42 = vpop.f32.mrb[11].mxu0  ;;  %v567_v39 = vld [vmem:[#allocation12] sm:$0xff] }
 0x14b   :  { %v910_v41 = vpop.f32.mrb[11].mxu1 }
 0x14e   :  { %436 = vmax.xlane.f32.xlu1 %v435_v40  ;;  %v568_v40 = vld [vmem:[#allocation12 + $0x8] sm:$0x3] }
 0x14f   :  { %v938_v31 = vpack.c.bf16 %v568_v40, %v567_v39 }
 0x152   :  { %584 = vmin.xlane.f32.xlu1 %v1314_v43 }
 0x1c6   :  { %v209_v44 = vpop.xlane.xlu0 %208 }
 0x1c7   :  { %v213_v45 = vsub.f32 %v153_v9, %v209_v44 }
 0x1c9   :  { %v214_v46 = vmul.f32 1.442695, %v213_v45 }
 0x1ca   :  { %v212_v47 = vpop.xlane.xlu0 %211 }
 0x1cb   :  { %960 = vpow2.f32 %v214_v46  ;;  %v224_v48 = vsub.f32 %v200_v10, %v212_v47 }
 0x1cd   :  { %v225_v49 = vmul.f32 1.442695, %v224_v48 }
 0x1cf   :  { %962 = vpow2.f32 %v225_v49 }
 0x1d5   :  { %v961_v50 = vpop.eup %960 }
 0x1d6   :  { %v216_v52 = vsel %vm206_vm4, %v961_v50, 0.0 }
 0x1d7   :  { %v448_v51 = vpop.xlane.xlu1 %447  ;;  %217 = vadd.xlane.f32.xlu0 %v216_v52  ;;  %v457_v52 = vld [vmem:[#allocation4] sm:$0xff] }
 0x1d8   :  { %v449_v53 = vsub.f32 %v428_v32, %v448_v51 }
 0x1d9   :  { %v963_v54 = vpop.eup %962 }
 0x1da   :  { %v450_v55 = vmul.f32 1.442695, %v449_v53  ;;  %v227_v57 = vsel %vm206_vm4, %v963_v54, 0.0 }
 0x1db   :  { %v437_v56 = vpop.xlane.xlu1 %436  ;;  %228 = vadd.xlane.f32.xlu0 %v227_v57  ;;  %v509_v57 = vld [vmem:[#allocation5] sm:$0xff] }
 0x1dc   :  { %964 = vpow2.f32 %v450_v55  ;;  %v438_v58 = vsub.f32 %v385_v33, %v437_v56 }
 0x1de   :  { %v439_v59 = vmul.f32 1.442695, %v438_v58 }
 0x1df   :  { %v585_v10 = vpop.xlane.xlu1 %584 }
 0x1e0   :  { %966 = vpow2.f32 %v439_v59  ;;  %vm586_vm8 = vcmp.eq.f32.partialorder %v1314_v43, %v585_v10  ;;  %v569_v43 = vld [vmem:[#allocation14] sm:$0xff]  ;;  %v591_v46 = vcvt.f32.s32 %v585_v10 }
 0x1e1   :  { %v587_v32 = vsel %vm586_vm8, %v582_v30, inf }
 0x1e2   :  { %v592_v48 = vshll.u32 %v591_v46, 16 }
 0x1e6   :  { %v965_v60 = vpop.eup %964 }
 0x1e7   :  { %v452_v61 = vsel %vm206_vm4, %v965_v60, 0.0 }
 0x1e8   :  { %453 = vadd.xlane.f32.xlu0 %v452_v61 }
 0x1ea   :  { %v967_v62 = vpop.eup %966 }
 0x1eb   :  { %v441_v63 = vsel %vm206_vm4, %v967_v62, 0.0 }
 0x1ec   :  { %442 = vadd.xlane.f32.xlu1 %v441_v63 }
 0x264   :  { %v218_v4 = vpop.xlane.xlu0 %217 }
 0x265   :  { %968 = vlog2.f32 %v218_v4 }
 0x268   :  { %v229_v5 = vpop.xlane.xlu0 %228 }
 0x269   :  { %970 = vlog2.f32 %v229_v5 }
 0x26f   :  { %v969_v6 = vpop.eup %968 }
 0x270   :  { %v220_v7 = vmul.f32 0.6931472, %v969_v6 }
 0x272   :  { %v221_v8 = vadd.f32 %v220_v7, %v209_v44  ;;  %v570_v44 = vld [vmem:[#allocation14 + $0x8] sm:$0x3] }
 0x273   :  { %v971_v9 = vpop.eup %970  ;;  %v942_v45 = vpack.c.bf16 %v570_v44, %v569_v43 }
 0x274   :  { %223 = vst.msk [vmem:[#allocation2] sm:$0xff] %vm222_vm6, %v221_v8  ;;  %v231_v11 = vmul.f32 0.6931472, %v971_v9 }
 0x275   :  { %v454_v12 = vpop.xlane.xlu0 %453 }
 0x276   :  { %972 = vrcp.f32 %v454_v12  ;;  %v232_v13 = vadd.f32 %v231_v11, %v212_v47 }
 0x278   :  { %233 = vst.msk [vmem:[#allocation3] sm:$0xff] %vm222_vm6, %v232_v13 }
 0x279   :  { %v443_v14 = vpop.xlane.xlu1 %442 }
 0x27a   :  { %974 = vrcp.f32 %v443_v14 }
 0x27b   :  { %v330_v15 = vld [vmem:[#allocation2] sm:$0xff] }
 0x27c   :  { %333 = vperm.xlu0 %958, %v330_v15  }
 0x27f   :  { %v339_v17 = vld [vmem:[#allocation3] sm:$0xff] }
 0x280   :  { %v973_v16 = vpop.eup %972  ;;  %342 = vperm.xlu1 %959, %v339_v17  }
 0x281   :  { %v456_v18 = vmul.f32 %v973_v16, %v965_v60 }
 0x283   :  { %v459_v19 = vpack.c.bf16 %v456_v18, %v456_v18 }
 0x284   :  { %v975_v20 = vpop.eup %974 }
 0x285   :  { %v465_v24 = vsel %vm463_vm7, %v459_v19, 0  ;;  %v445_v25 = vmul.f32 %v975_v20, %v967_v62 }
 0x286   :  { %912 = vmatpush3.bf16.msra.mxu0 %v465_v24 }
 0x287   :  { %v511_v26 = vpack.c.bf16 %v445_v25, %v445_v25  ;;  %937 = vmatprep.subr.bf16.mxu0 %v1138_v28 }
 0x289   :  { %v516_v27 = vsel %vm463_vm7, %v511_v26, 0 }
 0x28a   :  { %918 = vmatpush3.bf16.msra.mxu1 %v516_v27  ;;  %v778_v27 = vand.u32 2147483647, %v1262_v2 }
 0x28b   :  { %941 = vmatprep.subr.bf16.mxu1 %v1138_v28  ;;  %v773_v28 = vand.u32 2147483647, %v1260_v1 }
 0x28c   :  { %v852_v30 = vadd.f32 -1.0, %v778_v27 }
 0x2a4   :  { %588 = vmin.xlane.f32.xlu1 %v587_v32  ;;  %v851_v32 = vadd.f32 -1.0, %v773_v28 }
 0x2fb   :  { %v334_v33 = vpop.permute.xlu0 %333 }
 0x2fc   :  { %v336_v34 = vsub.f32 %v1303_v22, %v334_v33  ;;  %v780_v33 = vmul.f32 %v852_v30, %v852_v30 }
 0x2fe   :  { %v337_v35 = vmul.f32 1.442695, %v336_v34  ;;  %v775_v34 = vmul.f32 %v851_v32, %v851_v32 }
 0x2ff   :  { %v343_v36 = vpop.permute.xlu1 %342 }
 0x300   :  { %976 = vpow2.f32 %v337_v35  ;;  %v345_v37 = vsub.f32 %v1301_v21, %v343_v36  ;;  %v776_v39 = vmul.f32 0.0001, %v775_v34 }
 0x302   :  { %v346_v38 = vmul.f32 1.442695, %v345_v37  ;;  %v781_v37 = vmul.f32 0.0001, %v780_v33 }
 0x304   :  { %978 = vpow2.f32 %v346_v38 }
 0x30a   :  { %v977_v41 = vpop.eup %976 }
 0x30b   :  { %v458_v42 = vpack.c.bf16 %v977_v41, %v977_v41 }
 0x30d   :  { %914 = vmatmul.mubr.msk.bf16.vlgmr.msra.gmra.mrb[12].mxu0 %vm206_vm4, %v458_v42 }
 0x30e   :  { %v979_v22 = vpop.eup %978  ;;  %940 = vmatpush3.bf16.msk.msra.mxu0 %vm939_vm11, %v938_v31  ;;  %927 = vmatprep.mubr.msk.f32.mxu0 %vm1136_vm0, %v1135_v0 }
 0x30f   :  { %v510_v21 = vpack.c.bf16 %v979_v22, %v979_v22 }
 0x311   :  { %920 = vmatmul.mubr.msk.bf16.vlgmr.msra.gmra.mrb[12].mxu1 %vm206_vm4, %v510_v21 }
 0x312   :  { %944 = vmatpush3.bf16.msk.msra.mxu1 %vm939_vm11, %v942_v45  ;;  %934 = vmatprep.mubr.msk.f32.mxu1 %vm1136_vm0, %v1135_v0 }
 0x331   :  { %v589_v47 = vpop.xlane.xlu1 %588 }
 0x332   :  { %v590_v49 = vcvt.f32.s32 %v589_v47 }
 0x334   :  { %v593_v50 = vadd.s32 %v592_v48, %v590_v49 }
 0x336   :  { %vm594_vm12 = vcmp.eq.s32.totalorder %v1305_v23, %v593_v50 }
 0x337   :  { %v846_v51 = vsel %vm594_vm12, 1.0, %v1135_v0 }
 0x338   :  { %928 = vmatmul.mubr.msk.f32.vlgmr.msra.gmra.mrb[16].mxu0 %vm573_vm1, %v846_v51  ;;  %935 = vmatmul.mubr.msk.f32.vlgmr.msra.gmra.mrb[16].mxu1 %vm573_vm1, %v846_v51 }
 0x3e0   :  { %v501_v53 = vpop.f32.mrb[12].mxu0 }
 0x3e1   :  { %v507_v54 = vadd.f32 %v501_v53, %v457_v52  ;;  %v915_v55 = vpop.f32.mrb[13].mxu0 }
 0x3e2   :  { %v504_v56 = vpop.f32.mrb[14].mxu0 }
 0x3e3   :  { %508 = vst.msk [vmem:[#allocation4] sm:$0xff] %vm206_vm4, %v507_v54  ;;  %v916_v58 = vpop.f32.mrb[15].mxu0 }
 0x3e4   :  { %v552_v59 = vpop.f32.mrb[12].mxu1 }
 0x3e5   :  { %v558_v60 = vadd.f32 %v552_v59, %v509_v57  ;;  %v921_v61 = vpop.f32.mrb[13].mxu1 }
 0x3e6   :  { %v555_v62 = vpop.f32.mrb[14].mxu1 }
 0x3e7   :  { %559 = vst.msk [vmem:[#allocation5] sm:$0xff] %vm206_vm4, %v558_v60  ;;  %v922_v0 = vpop.f32.mrb[15].mxu1 }
 0x3ea   :  { %v783_v41 = vld [vmem:[#allocation4] sm:$0xff] }
 0x3ee   :  { %v784_v35 = vld [vmem:[#allocation5] sm:$0xff] }
 0x3ef   :  { %v785_v42 = vsub.f32 %v783_v41, %v784_v35 }
 0x3f1   :  { %v807_v22 = vmul.f32 %v785_v42, %v785_v42 }
 0x3f3   :  { %v808_v21 = vsel %vm206_vm4, %v807_v22, 0.0 }
 0x40b   :  { %v670_v23 = vpop.f32.mrb[16].mxu0  ;;  %v743_v63 = vpop.f32.mrb[16].mxu1 }
 0x40c   :  { %v747_v3 = vmul.f32 %v670_v23, %v1260_v1  ;;  %v754_v4 = vmul.f32 %v743_v63, %v1262_v2  ;;  %v929_v5 = vpop.f32.mrb[17].mxu0  ;;  %v936_v6 = vpop.f32.mrb[17].mxu1 }
 0x40e   :  { %v748_v7 = vadd.f32 1.0, %v747_v3  ;;  %v755_v8 = vadd.f32 1.0, %v754_v4 }
 0x410   :  { %v749_v9 = vmul.f32 0.5, %v748_v7  ;;  %v756_v10 = vmul.f32 0.5, %v755_v8 }
 0x412   :  { %980 = vlog2.f32 %v749_v9 }
 0x413   :  { %982 = vlog2.f32 %v756_v10 }
 0x41c   :  { %v981_v11 = vpop.eup %980 }
 0x41d   :  { %v983_v12 = vpop.eup %982  ;;  %v751_v13 = vmul.f32 0.6931472, %v981_v11 }
 0x41e   :  { %v758_v14 = vmul.f32 0.6931472, %v983_v12 }
 0x41f   :  { %v752_v15 = vmax.f32 %v751_v13, -100.0 }
 0x420   :  { %v759_v16 = vmax.f32 %v758_v14, -100.0 }
 0x421   :  { %v753_v17 = vsub.f32 0.0, %v752_v15 }
 0x422   :  { %v760_v18 = vsub.f32 0.0, %v759_v16 }
 0x423   :  { %v761_v19 = vsub.f32 0.0, %v753_v17 }
 0x424   :  { %v767_v20 = vsub.f32 0.0, %v760_v18 }
 0x425   :  { %v763_v24 = vmul.f32 0.03125, %v761_v19 }
 0x426   :  { %v768_v25 = vmul.f32 0.03125, %v767_v20 }
 0x427   :  { %v764_v26 = vmul.f32 1.442695, %v763_v24 }
 0x428   :  { %v769_v29 = vmul.f32 1.442695, %v768_v25 }
 0x429   :  { %984 = vpow2.f32 %v764_v26 }
 0x42a   :  { %986 = vpow2.f32 %v769_v29 }
 0x433   :  { %v985_v36 = vpop.eup %984 }
 0x434   :  { %v987_v38 = vpop.eup %986  ;;  %v766_v40 = vmul.f32 %v985_v36, %v753_v17 }
 0x435   :  { %v771_v31 = vmul.f32 %v987_v38, %v760_v18 }
 0x436   :  { %v772_v43 = vmul.f32 0.5, %v766_v40 }
 0x437   :  { %v782_v2 = vadd.f32 %v781_v37, %v771_v31 }
 0x438   :  { %v777_v44 = vadd.f32 %v776_v39, %v772_v43 }
 0x439   :  { %v796_v1 = vsel %vm159_vm3, %v782_v2, 0.0 }
 0x43a   :  { %797 = vadd.xlane.f32.xlu1 %v796_v1  ;;  %v786_v45 = vsel %vm112_vm2, %v777_v44, 0.0 }
 0x43b   :  { %787 = vadd.xlane.f32.xlu0 %v786_v45 }
 0x43e   :  { %809 = vadd.xlane.f32.xlu1 %v808_v21 }
 0x4c7   :  { %v798_v46 = vpop.xlane.xlu1 %797 }
 0x4c8   :  { %v799_v47 = vrot.slane %v798_v46, 4  ;;  %v788_v48 = vpop.xlane.xlu0 %787 }
 0x4c9   :  { %v789_v49 = vrot.slane %v788_v48, 4 }
 0x4ca   :  { %v800_v50 = vadd.f32 %v799_v47, %v798_v46 }
 0x4cb   :  { %v790_v51 = vadd.f32 %v789_v49, %v788_v48  ;;  %v810_v52 = vpop.xlane.xlu1 %809 }
 0x4cc   :  { %v801_v53 = vrot.slane %v800_v50, 2  ;;  %v811_v54 = vrot.slane %v810_v52, 4 }
 0x4cd   :  { %v791_v55 = vrot.slane %v790_v51, 2 }
 0x4ce   :  { %v802_v56 = vadd.f32 %v801_v53, %v800_v50  ;;  %v812_v57 = vadd.f32 %v811_v54, %v810_v52 }
 0x4cf   :  { %v792_v58 = vadd.f32 %v791_v55, %v790_v51 }
 0x4d0   :  { %v803_v59 = vrot.slane %v802_v56, 1  ;;  %v813_v60 = vrot.slane %v812_v57, 2 }
 0x4d1   :  { %v793_v61 = vrot.slane %v792_v58, 1 }
 0x4d2   :  { %v804_v62 = vadd.f32 %v803_v59, %v802_v56  ;;  %v814_v0 = vadd.f32 %v813_v60, %v812_v57 }
 0x4d3   :  { %v794_v23 = vadd.f32 %v793_v61, %v792_v58 }
 0x4d4   :  { %v815_v63 = vrot.slane %v814_v0, 1  ;;  %v805_v3 = vmul.f32 0.00390625, %v804_v62 }
 0x4d5   :  { %v795_v4 = vmul.f32 0.001953125, %v794_v23 }
 0x4d6   :  { %v816_v5 = vadd.f32 %v815_v63, %v814_v0 }
 0x4d7   :  { %v806_v6 = vadd.f32 %v805_v3, %v795_v4 }
 0x4d8   :  { %v817_v7 = vmul.f32 0.015625, %v816_v5 }
 0x4da   :  { %v818_v8 = vadd.f32 %v817_v7, %v806_v6 }
 0x4dc   :  { %820 = vst.msk [vmem:[#allocation15] sm:$0x1] %vm819_vm13, %v818_v8 }
 0x4dd   :  { %1109 = shalt.err (!%p1106_p2)
}
 0x4de   :  { %s1110_s27 = scalar_lea.hbm %s1363_s7, 16 }
 0x4df   :  { %p1111_p3 = scmp.ne.s32.totalorder %s1363_s7, %s1110_s27  ;;  %p1114_p4 = scmp.lt.u32.totalorder %s1110_s27, %s1363_s7 }
 0x4e1   :  { %p1116_p5 = pnand %p1114_p4, %p1111_p3 }
 0x4e3   :  { %1119 = shalt.err (!%p1116_p5)
}
 0x4e4   :  { %830 = dma.vmem_to_hbm [thread:$0]  %s828_s1, 16, %s1363_s7, [#allocation8]  }
 0x4e5   :  { %1126 = dma.done.wait [#allocation8], 16  }
 0x4e6   :  { %1127 = vsyncadd [#allocation8], 4294967280 }
 0x4e7   :  { %834 = vsyncpa [#allocation7], 1 }
 0x4e8   :  { %835 = vsyncpa [#allocation10], 1 }
 0x4e9   :  { %836 = vsyncpa [#allocation13], 1 }
 0x4ea   :  { %837 = vsyncpa [#allocation8], 1 }

</bundles_post_ra>
